<compile_context>
chip_gen: v5e
topology: v5e:2x2
jax: 0.10.0
libtpu: 0.0.40
codegen_flags: <defaults>
</compile_context>

<pallas_src>
import jax
import jax.numpy as jnp
import numpy as np
from jax.experimental import pallas as pl
from jax.experimental.pallas import tpu as pltpu


def e2e_kernel(rhs_ref, w_ref, bias_ref, o_ref):
    nb, P, _ = o_ref.shape                       # (nb, P, d*d)
    d = rhs_ref.shape[1] // nb

    # One fused MXU matmul: rows 0..P-1 = cnn1 path (a), rows P..2P-1 = cnn2 path (b).
    ab = jnp.dot(w_ref[...], rhs_ref[...],
                 preferred_element_type=jnp.float32)           # (2P, nb*d) f32 acc
    ab = ab + bias_ref[...]                                    # (2P,1); top P rows carry b1+b2

    a = ab[:P]                                                 # a[p, n*d + i]
    b = ab[P:]                                                 # b[p, n*d + j]

    # Lane-dense epilogue: out[n, p, i*d + j] = a[p, n*d+i] + b[p, n*d+j].
    for n in range(nb):                                        # static unroll, nb is small
        a_n = a[:, n * d:(n + 1) * d]                          # (P, d)
        b_n = b[:, n * d:(n + 1) * d]                          # (P, d)
        o_ref[n] = (a_n[:, :, None] + b_n[:, None, :]).reshape(P, d * d).astype(o_ref.dtype)


def _pick_nb(N, C, P, d):
    """Samples per grid block.

    * nb divides N and the RHS block last dim (nb*d) is a multiple of 128
      (or nb == N, i.e. block spans the whole axis)  -> valid BlockSpec.
    * double-buffered input + output tiles stay under ~24 MiB VMEM
      (safe wrt v7x's 64 MiB physical / 32 MiB scoped default).
    * prefer >= 512 free lanes per matmul and >= 2 grid steps (megacore /
      v7x dual-TensorCore sharding) when the batch is big enough.
    """
    def vmem_ok(nb):
        in_bytes = 2 * C * d * nb * d * 4        # RHS tile (f32 upper bound)
        out_bytes = nb * P * d * d * 4           # output tile
        return 2 * (in_bytes + out_bytes) <= (24 << 20)   # x2 double buffering

    valid = [nb for nb in range(1, N + 1)
             if N % nb == 0 and ((nb * d) % 128 == 0 or nb == N) and vmem_ok(nb)]
    if not valid:                                # pathological; fall back to whole batch
        return N
    prefer = [nb for nb in valid if nb * d >= 512 and N // nb >= 2]
    if prefer:
        return min(prefer)
    prefer = [nb for nb in valid if nb * d >= 512]
    if prefer:
        return min(prefer)
    return max(valid)


def e2e_block(x, w1, w2, b1, b2, *, nb=None, matmul_dtype=None):
    """out[n,p,i,j] = (cnn1(x))[n,p,i,0] + (cnn2(x))[n,p,0,j]  (PyTorch E2EBlock)."""
    N, C, d, _ = x.shape
    P = w1.shape[0]
    if matmul_dtype is None:
        matmul_dtype = x.dtype
    if nb is None:
        nb = _pick_nb(N, C, P, d)
    assert N % nb == 0

    # ---- trace-time glue (hoisted out of the kernel hot loop) ----------------
    # RHS rows 0..C*d-1    : rhs[c*d + j, n*d + i] = x[n,c,i,j]   (cnn1: contract (c,j))
    # RHS rows C*d..2C*d-1 : rhs[c*d + i, n*d + j] = x[n,c,i,j]   (cnn2: contract (c,i))
    r1 = jnp.transpose(x, (1, 3, 0, 2)).reshape(C * d, N * d)
    r2 = jnp.transpose(x, (1, 2, 0, 3)).reshape(C * d, N * d)
    rhs = jnp.concatenate([r1, r2], axis=0).astype(matmul_dtype)      # (2Cd, N*d)

    # Block-diagonal fused weights: one 2*C*d-deep matmul instead of two.
    w1_flat = w1.reshape(P, C * d)               # w1[p,c,0,j] -> [p, c*d + j]
    w2_flat = w2.reshape(P, C * d)               # w2[p,c,i,0] -> [p, c*d + i]
    zeros = jnp.zeros((P, C * d), w1_flat.dtype)
    w_big = jnp.concatenate(
        [jnp.concatenate([w1_flat, zeros], axis=1),
         jnp.concatenate([zeros, w2_flat], axis=1)], axis=0).astype(matmul_dtype)

    # Combined bias applied once to the cnn1 rows (out = a + b + b1 + b2).
    bias = jnp.concatenate([(b1 + b2).reshape(P, 1).astype(jnp.float32),
                            jnp.zeros((P, 1), jnp.float32)], axis=0)  # (2P, 1)

    out_flat = pl.pallas_call(
        e2e_kernel,
        out_shape=jax.ShapeDtypeStruct((N, P, d * d), jnp.float32),
        grid_spec=pltpu.PrefetchScalarGridSpec(
            num_scalar_prefetch=0,
            grid=(N // nb,),
            in_specs=[
                pl.BlockSpec((2 * C * d, nb * d), lambda g: (0, g)),   # RHS batch slab
                pl.BlockSpec((2 * P, 2 * C * d), lambda g: (0, 0)),    # resident weights
                pl.BlockSpec((2 * P, 1), lambda g: (0, 0)),            # resident bias
            ],
            out_specs=pl.BlockSpec((nb, P, d * d), lambda g: (g, 0, 0)),
        ),
        compiler_params=pltpu.CompilerParams(
            dimension_semantics=("parallel",)),
    )(rhs, w_big, bias)

    return out_flat.reshape(N, P, d, d)


def e2e_reference(x, w1, w2, b1, b2):
    # pure-JAX reference of the PyTorch forward (correctness check only)
    a = jnp.einsum('ncij,pcj->npi', x, w1[:, :, 0, :]) + b1[None, :, None]
    b = jnp.einsum('ncij,pci->npj', x, w2[:, :, :, 0]) + b2[None, :, None]
    return a[:, :, :, None] + b[:, :, None, :]


if __name__ == "__main__":
    N, C, P, d = 2, 4, 8, 16          # batch, in_planes, planes, roi_num
    key = jax.random.PRNGKey(0)
    kx, k1, k2, k3, k4 = jax.random.split(key, 5)

    x = jax.random.normal(kx, (N, C, d, d), dtype=jnp.float32)
    scale = 1.0 / np.sqrt(C * d)      # PyTorch-style uniform fan-in init
    w1 = jax.random.uniform(k1, (P, C, 1, d), jnp.float32, -scale, scale)
    w2 = jax.random.uniform(k2, (P, C, d, 1), jnp.float32, -scale, scale)
    b1 = jax.random.uniform(k3, (P,), jnp.float32, -scale, scale)
    b2 = jax.random.uniform(k4, (P,), jnp.float32, -scale, scale)

    ref = e2e_reference(x, w1, w2, b1, b2)

    # f32 MXU inputs: tight check against reference.
    out = jax.block_until_ready(e2e_block(x, w1, w2, b1, b2))
    np.testing.assert_allclose(np.asarray(out), np.asarray(ref), rtol=1e-5, atol=1e-5)

    # bf16 MXU inputs (v6e/v7x fast path), f32 accumulation: loose check.
    out_bf16 = jax.block_until_ready(
        e2e_block(x, w1, w2, b1, b2, matmul_dtype=jnp.bfloat16))
    np.testing.assert_allclose(np.asarray(out_bf16), np.asarray(ref),
                               rtol=5e-2, atol=1e-1)

    print("KERNEL_OK")
</pallas_src>

<mosaic_0001>
module attributes {stable_mosaic.version = 11 : i64} {
  func.func @e2e_kernel(%arg0: i32, %arg1: memref<128x32xf32, #tpu.memory_space<vmem>>, %arg2: memref<16x128xf32, #tpu.memory_space<vmem>>, %arg3: memref<16x1xf32, #tpu.memory_space<vmem>>, %arg4: memref<2x8x256xf32, #tpu.memory_space<vmem>>) attributes {dimension_semantics = [#tpu.dimension_semantics<parallel>], iteration_bounds = array<i64: 1>, scalar_prefetch = 0 : i64, scratch_operands = 0 : i64, tpu.core_type = #tpu.core_type<tc>, window_params = [{transform_indices = @transform_0, window_bounds = array<i64: 128, 32>}, {pipeline_mode = #tpu.pipeline_mode<synchronous>, transform_indices = @transform_1, window_bounds = array<i64: 16, 128>}, {pipeline_mode = #tpu.pipeline_mode<synchronous>, transform_indices = @transform_2, window_bounds = array<i64: 16, 1>}, {transform_indices = @transform_3, window_bounds = array<i64: 2, 8, 256>}]} {
    %c0 = arith.constant 0 : index
    %c0_0 = arith.constant 0 : index
    %0 = vector.load %arg2[%c0, %c0_0] : memref<16x128xf32, #tpu.memory_space<vmem>>, vector<16x128xf32>
    %c0_1 = arith.constant 0 : index
    %c0_2 = arith.constant 0 : index
    %1 = vector.load %arg1[%c0_1, %c0_2] : memref<128x32xf32, #tpu.memory_space<vmem>>, vector<128x32xf32>
    %cst = arith.constant dense<0.000000e+00> : vector<16x32xf32>
    %2 = tpu.matmul %0, %1, %cst {dimension_numbers = #tpu.dot_dimension_numbers<[1], [0], [0], [1], [0, 0, 1, 1], [], []>} : vector<16x128xf32>, vector<128x32xf32>, vector<16x32xf32> -> vector<16x32xf32>
    %c0_3 = arith.constant 0 : index
    %c0_4 = arith.constant 0 : index
    %3 = vector.load %arg3[%c0_3, %c0_4] : memref<16x1xf32, #tpu.memory_space<vmem>>, vector<16x1xf32>
    %4 = vector.broadcast %3 : vector<16x1xf32> to vector<16x32xf32>
    %5 = arith.addf %2, %4 : vector<16x32xf32>
    %6 = vector.extract_strided_slice %5 {offsets = [0, 0], sizes = [8, 32], strides = [1, 1]} : vector<16x32xf32> to vector<8x32xf32>
    %7 = vector.extract_strided_slice %5 {offsets = [8, 0], sizes = [8, 32], strides = [1, 1]} : vector<16x32xf32> to vector<8x32xf32>
    %8 = vector.extract_strided_slice %6 {offsets = [0, 0], sizes = [8, 16], strides = [1, 1]} : vector<8x32xf32> to vector<8x16xf32>
    %9 = vector.extract_strided_slice %7 {offsets = [0, 0], sizes = [8, 16], strides = [1, 1]} : vector<8x32xf32> to vector<8x16xf32>
    %10 = vector.shape_cast %8 : vector<8x16xf32> to vector<8x16x1xf32>
    %11 = vector.shape_cast %9 : vector<8x16xf32> to vector<8x1x16xf32>
    %12 = vector.broadcast %10 : vector<8x16x1xf32> to vector<8x16x16xf32>
    %13 = vector.broadcast %11 : vector<8x1x16xf32> to vector<8x16x16xf32>
    %14 = arith.addf %12, %13 : vector<8x16x16xf32>
    %15 = vector.shape_cast %14 : vector<8x16x16xf32> to vector<8x256xf32>
    %c0_5 = arith.constant 0 : index
    %c0_6 = arith.constant 0 : index
    %c0_7 = arith.constant 0 : index
    %16 = vector.load %arg4[%c0_5, %c0_6, %c0_7] : memref<2x8x256xf32, #tpu.memory_space<vmem>>, vector<1x8x256xf32>
    %17 = vector.shape_cast %16 : vector<1x8x256xf32> to vector<8x256xf32>
    %18 = vector.shape_cast %15 : vector<8x256xf32> to vector<1x8x256xf32>
    tpu.vector_store %arg4[%c0_5, %c0_6, %c0_7], %18 {strides = array<i32>} : memref<2x8x256xf32, #tpu.memory_space<vmem>>, vector<1x8x256xf32>,
    %19 = vector.extract_strided_slice %6 {offsets = [0, 16], sizes = [8, 16], strides = [1, 1]} : vector<8x32xf32> to vector<8x16xf32>
    %20 = vector.extract_strided_slice %7 {offsets = [0, 16], sizes = [8, 16], strides = [1, 1]} : vector<8x32xf32> to vector<8x16xf32>
    %21 = vector.shape_cast %19 : vector<8x16xf32> to vector<8x16x1xf32>
    %22 = vector.shape_cast %20 : vector<8x16xf32> to vector<8x1x16xf32>
    %23 = vector.broadcast %21 : vector<8x16x1xf32> to vector<8x16x16xf32>
    %24 = vector.broadcast %22 : vector<8x1x16xf32> to vector<8x16x16xf32>
    %25 = arith.addf %23, %24 : vector<8x16x16xf32>
    %26 = vector.shape_cast %25 : vector<8x16x16xf32> to vector<8x256xf32>
    %c1 = arith.constant 1 : index
    %c0_8 = arith.constant 0 : index
    %c0_9 = arith.constant 0 : index
    %27 = vector.load %arg4[%c1, %c0_8, %c0_9] : memref<2x8x256xf32, #tpu.memory_space<vmem>>, vector<1x8x256xf32>
    %28 = vector.shape_cast %27 : vector<1x8x256xf32> to vector<8x256xf32>
    %29 = vector.shape_cast %26 : vector<8x256xf32> to vector<1x8x256xf32>
    tpu.vector_store %arg4[%c1, %c0_8, %c0_9], %29 {strides = array<i32>} : memref<2x8x256xf32, #tpu.memory_space<vmem>>, vector<1x8x256xf32>,
    return
  }
  func.func @transform_0(%arg0: i32) -> (i32, i32) {
    %c0_i32 = arith.constant 0 : i32
    %c0_i32_0 = arith.constant 0 : i32
    return %c0_i32, %arg0 : i32, i32
  }
  func.func @transform_1(%arg0: i32) -> (i32, i32) {
    %c0_i32 = arith.constant 0 : i32
    %c0_i32_0 = arith.constant 0 : i32
    %c0_i32_1 = arith.constant 0 : i32
    return %c0_i32, %c0_i32_0 : i32, i32
  }
  func.func @transform_2(%arg0: i32) -> (i32, i32) {
    %c0_i32 = arith.constant 0 : i32
    %c0_i32_0 = arith.constant 0 : i32
    %c0_i32_1 = arith.constant 0 : i32
    return %c0_i32, %c0_i32_0 : i32, i32
  }
  func.func @transform_3(%arg0: i32) -> (i32, i32, i32) {
    %c0_i32 = arith.constant 0 : i32
    %c0_i32_0 = arith.constant 0 : i32
    %c0_i32_1 = arith.constant 0 : i32
    return %arg0, %c0_i32, %c0_i32_0 : i32, i32, i32
  }
}

</mosaic_0001>

<bundles_post_ra>
// kernel: tpu_custom_call.1
= control target key start
LH: loop header
LB: loop body
LE: loop exit
PB: predicated region body
PF: predicated region fallthrough
CT: control target
= control target key end

     0   :  { %v1083_v3 = vmov 0   ;;  %s1655_s0 = inlined_call_operand.vmem [shape: f32[128,32], index: 0, kind: input, shape index: {}]   ;;  %s1656_s1 = inlined_call_operand.vmem [shape: f32[16,128], index: 1, kind: input, shape index: {}]   ;;  %s1657_s2 = inlined_call_operand.vmem [shape: f32[16,1], index: 2, kind: input, shape index: {}]   ;;  %s1658_s3 = inlined_call_operand.hbm [shape: f32[2,8,256], index: 3, kind: output, shape index: {}]  }
   0x1   :  { %v32_v0 = vld [vmem:[%s1655_s0 + $0x78] sm:$0xff]  ;;  %v31_v1 = vld [vmem:[%s1655_s0 + $0x70] sm:$0xff]  ;;  %v30_v2 = vld [vmem:[%s1655_s0 + $0x68] sm:$0xff]  ;;  %1035 = vset.pattern.permute.xlu0 %v1083_v3 }
   0x2   :  { %45 = vmatpush.msra.mxu0 %v32_v0  ;;  %1007 = vmatpush.msra.mxu1 %v32_v0  ;;  %v29_v4 = vld [vmem:[%s1655_s0 + $0x60] sm:$0xff]  ;;  %v28_v5 = vld [vmem:[%s1655_s0 + $0x58] sm:$0xff] }
   0x3   :  { %v33_v6 = vld [vmem:[%s1657_s2] sm:$0xff] }
   0x4   :  { %46 = vmatpush.msra.mxu0 %v31_v1  ;;  %1008 = vmatpush.msra.mxu1 %v31_v1 }
   0x6   :  { %47 = vmatpush.msra.mxu0 %v30_v2  ;;  %1009 = vmatpush.msra.mxu1 %v30_v2 }
   0x7   :  { %8 = vsyncpa [#allocation3], 0  ;;  %v27_v7 = vld [vmem:[%s1655_s0 + $0x50] sm:$0xff]  ;;  %37 = vperm.xlu0 %1035, %v33_v6   ;;  %v26_v8 = vld [vmem:[%s1655_s0 + $0x48] sm:$0xff]  ;;  %v69_v21 = vlaneseq  ;;  %v1084_v47 = vmov 1983009808  }
   0x8   :  { %48 = vmatpush.msra.mxu0 %v29_v4  ;;  %1010 = vmatpush.msra.mxu1 %v29_v4  ;;  %v25_v9 = vld [vmem:[%s1655_s0 + $0x40] sm:$0xff]  ;;  %v34_v10 = vld [vmem:[%s1657_s2 + $0x8] sm:$0xff]  ;;  %v24_v11 = vld [vmem:[%s1655_s0 + $0x38] sm:$0xff]  ;;  %v218_v48 = vunpack.c.l.s4 %v1084_v47  ;;  %vm213_vm0 = vcmask 1047556   ;;  %s1088_s24 = smov 48   ;;  %s1089_s25 = smov 96  }
   0x9   :  { %v23_v12 = vld [vmem:[%s1655_s0 + $0x30] sm:$0xff]  ;;  %v22_v13 = vld [vmem:[%s1655_s0 + $0x28] sm:$0xff]  ;;  %v21_v14 = vld [vmem:[%s1655_s0 + $0x20] sm:$0xff]  ;;  %v70_v22 = vshrl.u32 %v69_v21, 7  ;;  %s1090_s26 = smov 32   ;;  %s1091_s27 = smov 80  }
   0xa   :  { %49 = vmatpush.msra.mxu0 %v28_v5  ;;  %1011 = vmatpush.msra.mxu1 %v28_v5  ;;  %v20_v15 = vld [vmem:[%s1655_s0 + $0x18] sm:$0xff]  ;;  %v19_v16 = vld [vmem:[%s1655_s0 + $0x10] sm:$0xff]  ;;  %v18_v17 = vld [vmem:[%s1655_s0 + $0x8] sm:$0xff]  ;;  %v1214_v55 = vunpack.c.0.s8 %v218_v48  ;;  %s1092_s28 = smov 64   ;;  %vm493_vm1 = vcmask 130048   ;;  %vm495_vm2 = vcmask 261120  }
   0xb   :  { %v17_v18 = vld [vmem:[%s1655_s0] sm:$0xff]  ;;  %v16_v20 = vld [vmem:[%s1656_s1 + $0x8] sm:$0xff]  ;;  %1038 = vset.pattern.permute.xlu2 %v70_v22  ;;  %1036 = vset.pattern.permute.xlu1 %v70_v22  ;;  %v77_v29 = vadd.s32 8, %v70_v22  ;;  %v1181_v33 = vadd.s32 24, %v70_v22  ;;  %v1188_v35 = vadd.s32 16, %v70_v22  ;;  %s1086_s0 = smov 112  }
   0xc   :  { %50 = vmatpush.msra.mxu0 %v27_v7  ;;  %1012 = vmatpush.msra.mxu1 %v27_v7  ;;  %v15_v19 = vld [vmem:[%s1656_s1] sm:$0xff]  ;;  %s1087_s1 = smov 16   ;;  %vm497_vm3 = vcmask 392192   ;;  %vm499_vm4 = vcmask 523264   ;;  %vm501_vm5 = vcmask 654336   ;;  %vm503_vm6 = vcmask 785408  }
   0xd   :  { %vm505_vm7 = vcmask 916480   ;;  %s995_s4 = sshll.u32 %s1658_s3, 4  ;;  %s1093_s5 = smov [#allocation2]   ;;  %s996_s4 = int_to_ptr.hbm [resolvable:$true] %s995_s4 }
   0xe   :  { %51 = vmatpush.msra.mxu0 %v26_v8  ;;  %1013 = vmatpush.msra.mxu1 %v26_v8  ;;  %s993_s6 = sshll.u32 %s1093_s5, 4  ;;  %s1094_s7 = smov 256   ;;  %s994_s6 = int_to_ptr.vmem [resolvable:$true] %s993_s6 }
   0xf   :  { %42 = vperm.xlu0 %1035, %v34_v10  }
  0x10   :  { %52 = vmatpush.msra.mxu0 %v25_v9  ;;  %1014 = vmatpush.msra.mxu1 %v25_v9 }
  0x12   :  { %53 = vmatpush.msra.mxu0 %v24_v11  ;;  %1015 = vmatpush.msra.mxu1 %v24_v11 }
  0x14   :  { %54 = vmatpush.msra.mxu0 %v23_v12  ;;  %1016 = vmatpush.msra.mxu1 %v23_v12 }
  0x16   :  { %55 = vmatpush.msra.mxu0 %v22_v13  ;;  %1017 = vmatpush.msra.mxu1 %v22_v13 }
  0x17   :  { %1040 = vset.pattern.permute.xlu0 %v70_v22 }
  0x18   :  { %56 = vmatpush.msra.mxu0 %v21_v14  ;;  %1018 = vmatpush.msra.mxu1 %v21_v14 }
  0x1a   :  { %57 = vmatpush.msra.mxu0 %v20_v15  ;;  %1019 = vmatpush.msra.mxu1 %v20_v15 }
  0x1c   :  { %58 = vmatpush.msra.mxu0 %v19_v16  ;;  %1020 = vmatpush.msra.mxu1 %v19_v16 }
  0x1e   :  { %59 = vmatpush.msra.mxu0 %v18_v17  ;;  %1021 = vmatpush.msra.mxu1 %v18_v17 }
  0x20   :  { %60 = vmatpush.msra.mxu0 %v17_v18  ;;  %1022 = vmatpush.msra.mxu1 %v17_v18 }
  0x21   :  { %61 = vmatmul.f32.vlgmr.msra.gmra.mxu0 %v15_v19  ;;  %64 = vmatmul.f32.vlgmr.msra.gmra.mxu1 %v16_v20 }
  0x79   :  { %v38_v23 = vpop.permute.xlu0 %37 }
  0x81   :  { %v43_v37 = vpop.permute.xlu0 %42 }
  0x9e   :  { %v62_v24 = vpop.f32.mrf.mxu0  ;;  %v65_v38 = vpop.f32.mrf.mxu1 }
  0x9f   :  { %v63_v25 = vadd.f32 %v62_v24, %v38_v23  ;;  %v1198_v39 = vadd.f32 %v65_v38, %v43_v37 }
  0xa1   :  { %v94_v26 = vperm.slane %v63_v25, 2  ;;  %v81_v27 = vperm.slane %v63_v25, 1  ;;  %v68_v28 = vperm.slane %v63_v25, 0  ;;  %v1175_v30 = vperm.slane %v63_v25, 4 }
  0xa2   :  { %v1178_v31 = vperm.slane %v63_v25, 7  ;;  %v107_v32 = vperm.slane %v63_v25, 3  ;;  %v1185_v34 = vperm.slane %v63_v25, 5  ;;  %v146_v36 = vperm.slane %v63_v25, 6 }
  0xa3   :  { %99 = vperm.xlu0 %1040, %v94_v26   ;;  %86 = vperm.xlu2 %1038, %v81_v27   ;;  %v174_v41 = vrot.slane %v1198_v39, 2  ;;  %v173_v42 = vrot.slane %v1198_v39, 1  ;;  %v1207_v46 = vperm.slane %v1198_v39, 0  ;;  %v175_v54 = vrot.slane %v1198_v39, 3 }
  0xa4   :  { %73 = vperm.xlu1 %1036, %v68_v28   ;;  %v177_v21 = vrot.slane %v1198_v39, 5  ;;  %v176_v25 = vrot.slane %v1198_v39, 4  ;;  %v178_v38 = vrot.slane %v1198_v39, 6 }
  0xa5   :  { %v1204_v43 = vperm.slane %v174_v41, 0  ;;  %v1211_v52 = vperm.slane %v173_v42, 0  ;;  %v1219_v60 = vperm.slane %v175_v54, 0 }
  0xa6   :  { %v1269_v48 = vperm.slane %v178_v38, 0 }
  0xab   :  { %1042 = vset.pattern.permute.xlu0 %v77_v29  ;;  %1039 = vset.pattern.permute.xlu2 %v77_v29 }
  0xac   :  { %1037 = vset.pattern.permute.xlu1 %v77_v29 }
  0xb3   :  { %131 = vperm.xlu0 %1042, %v1175_v30   ;;  %92 = vperm.xlu2 %1039, %v81_v27  }
  0xb4   :  { %79 = vperm.xlu1 %1037, %v68_v28  }
  0xbb   :  { %1045 = vset.pattern.permute.xlu0 %v70_v22  ;;  %1041 = vset.pattern.permute.xlu2 %v70_v22 }
  0xbc   :  { %105 = vperm.xlu1 %1037, %v94_v26  }
  0xc3   :  { %164 = vperm.xlu0 %1045, %v1178_v31   ;;  %112 = vperm.xlu2 %1041, %v107_v32  }
  0xc4   :  { %118 = vperm.xlu1 %1037, %v107_v32  }
  0xcb   :  { %1048 = vset.pattern.permute.xlu0 %v1181_v33  ;;  %125 = vperm.xlu2 %1041, %v1175_v30  }
  0xcc   :  { %1043 = vset.pattern.permute.xlu1 %v70_v22 }
  0xd3   :  { %1044 = vset.pattern.permute.xlu2 %v77_v29  ;;  %526 = vperm.xlu0 %1048, %v68_v28  }
  0xd4   :  { %138 = vperm.xlu1 %1043, %v1185_v34  }
  0xdb   :  { %144 = vperm.xlu2 %1044, %v1185_v34   ;;  %1051 = vset.pattern.permute.xlu0 %v1188_v35 }
  0xdc   :  { %151 = vperm.xlu1 %1043, %v146_v36  }
  0xe3   :  { %157 = vperm.xlu2 %1044, %v146_v36   ;;  %556 = vperm.xlu0 %1051, %v107_v32  }
  0xe4   :  { %1046 = vset.pattern.permute.xlu1 %v77_v29 }
  0xeb   :  { %1047 = vset.pattern.permute.xlu2 %v1188_v35  ;;  %1054 = vset.pattern.permute.xlu0 %v1181_v33 }
  0xec   :  { %170 = vperm.xlu1 %1046, %v1178_v31  }
  0xf3   :  { %610 = vperm.xlu0 %1054, %v1178_v31   ;;  %520 = vperm.xlu2 %1047, %v68_v28  }
  0xf4   :  { %1049 = vset.pattern.permute.xlu1 %v1188_v35 }
  0xfb   :  { %1050 = vset.pattern.permute.xlu2 %v1181_v33 }
  0xfc   :  { %532 = vperm.xlu1 %1049, %v81_v27  }
  0xfd   :  { %v87_v40 = vpop.permute.xlu2 %86 }
  0xfe   :  { %v198_v57 = vadd.f32 %v1211_v52, %v87_v40 }
 0x100   :  { %v227_v63 = vrot.slane %v198_v57, 4 }
 0x103   :  { %538 = vperm.xlu2 %1050, %v81_v27   ;;  %v1253_v27 = vperm.slane %v177_v21, 0 }
 0x104   :  { %544 = vperm.xlu1 %1049, %v94_v26  }
 0x10b   :  { %550 = vperm.xlu2 %1050, %v94_v26  }
 0x10c   :  { %1052 = vset.pattern.permute.xlu1 %v1181_v33 }
 0x10d   :  { %v93_v44 = vpop.permute.xlu2 %92 }
 0x10e   :  { %v199_v24 = vadd.f32 %v1211_v52, %v93_v44 }
 0x113   :  { %1053 = vset.pattern.permute.xlu2 %v1188_v35 }
 0x114   :  { %562 = vperm.xlu1 %1052, %v107_v32  }
 0x115   :  { %v100_v45 = vpop.permute.xlu0 %99 }
 0x116   :  { %v200_v49 = vadd.f32 %v1204_v43, %v100_v45  ;;  %v74_v50 = vpop.permute.xlu1 %73 }
 0x117   :  { %v196_v51 = vadd.f32 %v1207_v46, %v74_v50 }
 0x118   :  { %v212_v53 = vrot.slane %v200_v49, 4 }
 0x119   :  { %v215_v56 = vrot.slane %v196_v51, 4 }
 0x11a   :  { %v214_v58 = vsel %vm213_vm0, %v212_v53, %v196_v51 }
 0x11b   :  { %v216_v59 = vsel %vm213_vm0, %v200_v49, %v215_v56  ;;  %592 = vperm.xlu2 %1053, %v146_v36   ;;  %v220_v1 = vperm.slane %v214_v58, %v1214_v55  ;;  %v179_v56 = vrot.slane %v1198_v39, 7 }
 0x11c   :  { %598 = vperm.xlu1 %1052, %v146_v36   ;;  %v224_v61 = vperm.slane %v216_v59, %v1214_v55  ;;  %v1259_v36 = vperm.slane %v176_v25, 0 }
 0x11d   :  { %v113_v62 = vpop.permute.xlu2 %112  ;;  %v263_v7 = vrot.slane %v220_v1, 4 }
 0x11e   :  { %v202_v0 = vadd.f32 %v1219_v60, %v113_v62  ;;  %v275_v4 = vrot.slane %v224_v61, 4 }
 0x120   :  { %v225_v2 = vrot.slane %v202_v0, 4  ;;  %v228_v3 = vsel %vm213_vm0, %v202_v0, %v227_v63 }
 0x121   :  { %v236_v5 = vperm.slane %v228_v3, %v1214_v55 }
 0x122   :  { %v226_v6 = vsel %vm213_vm0, %v225_v2, %v198_v57  ;;  %v1289_v2 = vperm.slane %v179_v56, 0 }
 0x123   :  { %v232_v8 = vperm.slane %v226_v6, %v1214_v55  ;;  %v273_v9 = vrot.slane %v236_v5, 4  ;;  %604 = vperm.xlu2 %1053, %v1178_v31   ;;  %v1230_v10 = vsel %vm213_vm0, %v236_v5, %v275_v4 }
 0x124   :  { %1055 = vset.pattern.permute.xlu1 %v1188_v35  ;;  %v339_v35 = vrot.slane %v199_v24, 4 }
 0x125   :  { %v261_v11 = vrot.slane %v232_v8, 4  ;;  %v1234_v12 = vsel %vm213_vm0, %v232_v8, %v263_v7  ;;  %v1237_v13 = vsel %vm213_vm0, %v273_v9, %v224_v61  ;;  %v126_v17 = vpop.permute.xlu2 %125  ;;  %v132_v28 = vpop.permute.xlu0 %131 }
 0x126   :  { %v80_v14 = vpop.permute.xlu1 %79  ;;  %v205_v40 = vadd.f32 %v1259_v36, %v132_v28 }
 0x127   :  { %v197_v15 = vadd.f32 %v1207_v46, %v80_v14  ;;  %v1241_v16 = vsel %vm213_vm0, %v261_v11, %v220_v1  ;;  %v204_v14 = vadd.f32 %v1259_v36, %v126_v17 }
 0x128   :  { %v351_v54 = vrot.slane %v205_v40, 4 }
 0x129   :  { %v327_v19 = vrot.slane %v197_v15, 4 }
 0x12b   :  { %1056 = vset.pattern.permute.xlu2 %v1181_v33 }
 0x12c   :  { %568 = vperm.xlu1 %1055, %v1175_v30  }
 0x12e   :  { %v106_v18 = vpop.permute.xlu1 %105 }
 0x12f   :  { %v201_v20 = vadd.f32 %v1204_v43, %v106_v18  ;;  %v1085_v18 = vmov 1934713408  }
 0x131   :  { %v325_v22 = vrot.slane %v201_v20, 4  ;;  %v328_v23 = vsel %vm213_vm0, %v201_v20, %v327_v19  ;;  %v266_v19 = vunpack.c.l.s4 %v1085_v18 }
 0x132   :  { %v336_v31 = vperm.slane %v328_v23, %v1214_v55 }
 0x133   :  { %v326_v26 = vsel %vm213_vm0, %v325_v22, %v197_v15  ;;  %574 = vperm.xlu2 %1056, %v1175_v30   ;;  %v239_v22 = vrot.slane %v204_v14, 4 }
 0x134   :  { %580 = vperm.xlu1 %1055, %v1185_v34   ;;  %v332_v30 = vperm.slane %v326_v26, %v1214_v55  ;;  %v387_v44 = vrot.slane %v336_v31, 4 }
 0x135   :  { %v145_v29 = vpop.permute.xlu2 %144  ;;  %v165_v57 = vpop.permute.xlu0 %164 }
 0x136   :  { %v1257_v32 = vadd.f32 %v1253_v27, %v145_v29  ;;  %v119_v33 = vpop.permute.xlu1 %118  ;;  %v375_v49 = vrot.slane %v332_v30, 4  ;;  %v210_v3 = vadd.f32 %v1289_v2, %v165_v57 }
 0x137   :  { %v203_v37 = vadd.f32 %v1219_v60, %v119_v33 }
 0x138   :  { %v249_v7 = vrot.slane %v210_v3, 4 }
 0x139   :  { %v337_v41 = vrot.slane %v203_v37, 4  ;;  %v340_v42 = vsel %vm213_vm0, %v203_v37, %v339_v35 }
 0x13a   :  { %v348_v45 = vperm.slane %v340_v42, %v1214_v55 }
 0x13b   :  { %v338_v47 = vsel %vm213_vm0, %v337_v41, %v199_v24  ;;  %586 = vperm.xlu2 %1056, %v1185_v34   ;;  %v1304_v24 = vunpack.c.0.s8 %v266_v19 }
 0x13c   :  { %v344_v50 = vperm.slane %v338_v47, %v1214_v55  ;;  %v385_v51 = vrot.slane %v348_v45, 4  ;;  %v1273_v53 = vsel %vm213_vm0, %v348_v45, %v387_v44 }
 0x13d   :  { %v158_v58 = vpop.permute.xlu2 %157  ;;  %v268_v17 = vperm.slane %v1241_v16, %v1304_v24  ;;  %v280_v29 = vperm.slane %v1237_v13, %v1304_v24  ;;  %v272_v37 = vperm.slane %v1234_v12, %v1304_v24  ;;  %v284_v38 = vperm.slane %v1230_v10, %v1304_v24 }
 0x13e   :  { %v373_v59 = vrot.slane %v344_v50, 4  ;;  %v209_v61 = vadd.f32 %v1269_v48, %v158_v58  ;;  %v1278_v62 = vsel %vm213_vm0, %v344_v50, %v375_v49  ;;  %v1281_v34 = vsel %vm213_vm0, %v385_v51, %v336_v31 }
 0x13f   :  { %v311_v44 = vrot.slane %v268_v17, 4  ;;  %v319_v45 = vrot.slane %v280_v29, 4  ;;  %v315_v58 = vrot.slane %v272_v37, 4 }
 0x140   :  { %v349_v63 = vrot.slane %v209_v61, 4  ;;  %v1284_v0 = vsel %vm213_vm0, %v209_v61, %v351_v54  ;;  %v1287_v1 = vsel %vm213_vm0, %v373_v59, %v332_v30  ;;  %v323_v59 = vrot.slane %v284_v38, 4 }
 0x141   :  { %v360_v19 = vperm.slane %v1284_v0, %v1214_v55  ;;  %v384_v0 = vperm.slane %v1278_v62, %v1304_v24 }
 0x142   :  { %v1292_v39 = vsel %vm213_vm0, %v349_v63, %v205_v40 }
 0x145   :  { %v527_v4 = vpop.permute.xlu0 %526 }
 0x146   :  { %v1296_v5 = vadd.f32 %v527_v4, %v1207_v46  ;;  %v139_v6 = vpop.permute.xlu1 %138 }
 0x147   :  { %v206_v8 = vadd.f32 %v1253_v27, %v139_v6 }
 0x149   :  { %v250_v9 = vsel %vm213_vm0, %v249_v7, %v206_v8  ;;  %v251_v11 = vrot.slane %v206_v8, 4 }
 0x14a   :  { %v256_v25 = vperm.slane %v250_v9, %v1214_v55 }
 0x14b   :  { %v252_v15 = vsel %vm213_vm0, %v210_v3, %v251_v11 }
 0x14c   :  { %v260_v20 = vperm.slane %v252_v15, %v1214_v55  ;;  %v285_v30 = vrot.slane %v256_v25, 4 }
 0x14d   :  { %v1341_v8 = vpop.permute.xlu2 %520 }
 0x14e   :  { %v152_v21 = vpop.permute.xlu1 %151  ;;  %v297_v31 = vrot.slane %v260_v20, 4 }
 0x14f   :  { %v208_v23 = vadd.f32 %v1269_v48, %v152_v21  ;;  %v363_v21 = vrot.slane %v1257_v32, 4 }
 0x151   :  { %v237_v26 = vrot.slane %v208_v23, 4  ;;  %v240_v28 = vsel %vm213_vm0, %v208_v23, %v239_v22  ;;  %v356_v23 = vperm.slane %v1292_v39, %v1214_v55  ;;  %v380_v39 = vperm.slane %v1287_v1, %v1304_v24 }
 0x152   :  { %v248_v33 = vperm.slane %v240_v28, %v1214_v55  ;;  %v396_v28 = vperm.slane %v1273_v53, %v1304_v24 }
 0x153   :  { %v238_v35 = vsel %vm213_vm0, %v237_v26, %v204_v14 }
 0x154   :  { %v244_v40 = vperm.slane %v238_v35, %v1214_v55  ;;  %v299_v41 = vrot.slane %v248_v33, 4  ;;  %v298_v16 = vsel %vm213_vm0, %v297_v31, %v248_v33  ;;  %v392_v35 = vperm.slane %v1281_v34, %v1304_v24 }
 0x155   :  { %v557_v42 = vpop.permute.xlu0 %556  ;;  %v304_v13 = vperm.slane %v298_v16, %v1304_v24 }
 0x156   :  { %v287_v47 = vrot.slane %v244_v40, 4  ;;  %v618_v49 = vadd.f32 %v557_v42, %v1219_v60  ;;  %v286_v50 = vsel %vm213_vm0, %v285_v30, %v244_v40  ;;  %v300_v12 = vsel %vm213_vm0, %v260_v20, %v299_v41 }
 0x157   :  { %v292_v10 = vperm.slane %v286_v50, %v1304_v24  ;;  %v308_v51 = vperm.slane %v300_v12, %v1304_v24  ;;  %v1327_v54 = vsel %vm213_vm0, %v304_v13, %v319_v45  ;;  %v317_v56 = vrot.slane %v304_v13, 4 }
 0x158   :  { %656 = vrot.lane.b32.xlu0 %v618_v49, %s1086_s0  ;;  %v288_v57 = vsel %vm213_vm0, %v256_v25, %v287_v47  ;;  %v435_v41 = vrot.slane %v396_v28, 4  ;;  %v427_v42 = vrot.slane %v384_v0, 4  ;;  %v431_v45 = vrot.slane %v392_v35, 4 }
 0x159   :  { %v1332_v61 = vsel %vm213_vm0, %v292_v10, %v311_v44  ;;  %v309_v63 = vrot.slane %v292_v10, 4  ;;  %v296_v3 = vperm.slane %v288_v57, %v1304_v24  ;;  %v321_v4 = vrot.slane %v308_v51, 4 }
 0x15a   :  { %v1336_v6 = vsel %vm213_vm0, %v317_v56, %v280_v29  ;;  %v1339_v7 = vsel %vm213_vm0, %v308_v51, %v323_v59  ;;  %v423_v49 = vrot.slane %v380_v39, 4 }
 0x15b   :  { %v1344_v9 = vsel %vm213_vm0, %v296_v3, %v315_v58  ;;  %v1347_v11 = vsel %vm213_vm0, %v321_v4, %v284_v38  ;;  %v313_v14 = vrot.slane %v296_v3, 4  ;;  %v1350_v15 = vsel %vm213_vm0, %v309_v63, %v268_v17 }
 0x15c   :  { %v411_v17 = vrot.slane %v360_v19, 4 }
 0x15d   :  { %v1353_v18 = vsel %vm213_vm0, %v313_v14, %v272_v37  ;;  %v539_v31 = vpop.permute.xlu2 %538  ;;  %v399_v37 = vrot.slane %v356_v23, 4 }
 0x15e   :  { %v171_v20 = vpop.permute.xlu1 %170 }
 0x15f   :  { %v211_v22 = vadd.f32 %v1289_v2, %v171_v20 }
 0x161   :  { %v361_v25 = vrot.slane %v211_v22, 4  ;;  %v364_v26 = vsel %vm213_vm0, %v211_v22, %v363_v21  ;;  %v615_v22 = vadd.f32 %v539_v31, %v1211_v52 }
 0x162   :  { %v372_v29 = vperm.slane %v364_v26, %v1214_v55 }
 0x163   :  { %v362_v33 = vsel %vm213_vm0, %v361_v25, %v1257_v32 }
 0x164   :  { %v368_v38 = vperm.slane %v362_v33, %v1214_v55  ;;  %v409_v53 = vrot.slane %v372_v29, 4  ;;  %v412_v30 = vsel %vm213_vm0, %v372_v29, %v411_v17 }
 0x165   :  { %v420_v40 = vperm.slane %v412_v30, %v1304_v24  ;;  %v551_v4 = vpop.permute.xlu2 %550 }
 0x166   :  { %v397_v62 = vrot.slane %v368_v38, 4  ;;  %v400_v16 = vsel %vm213_vm0, %v368_v38, %v399_v37  ;;  %v410_v34 = vsel %vm213_vm0, %v409_v53, %v360_v19 }
 0x167   :  { %v408_v32 = vperm.slane %v400_v16, %v1304_v24  ;;  %v1380_v44 = vsel %vm213_vm0, %v420_v40, %v435_v41  ;;  %v433_v1 = vrot.slane %v420_v40, 4  ;;  %v416_v13 = vperm.slane %v410_v34, %v1304_v24 }
 0x168   :  { %v398_v47 = vsel %vm213_vm0, %v397_v62, %v356_v23 }
 0x169   :  { %v425_v50 = vrot.slane %v408_v32, 4  ;;  %v404_v12 = vperm.slane %v398_v47, %v1304_v24  ;;  %v1386_v10 = vsel %vm213_vm0, %v408_v32, %v427_v42  ;;  %v1389_v51 = vsel %vm213_vm0, %v433_v1, %v396_v28 }
 0x16a   :  { %v432_v56 = vsel %vm213_vm0, %v416_v13, %v431_v45  ;;  %v429_v57 = vrot.slane %v416_v13, 4 }
 0x16b   :  { %v426_v58 = vsel %vm213_vm0, %v425_v50, %v384_v0  ;;  %v421_v59 = vrot.slane %v404_v12, 4  ;;  %v424_v63 = vsel %vm213_vm0, %v404_v12, %v423_v49 }
 0x16c   :  { %v430_v3 = vsel %vm213_vm0, %v429_v57, %v392_v35 }
 0x16d   :  { %v1396_v14 = vsel %vm213_vm0, %v421_v59, %v380_v39  ;;  %v617_v39 = vadd.f32 %v551_v4, %v1204_v43 }
 0x16e   :  { %v533_v19 = vpop.permute.xlu1 %532 }
 0x16f   :  { %v614_v35 = vadd.f32 %v533_v19, %v1211_v52  ;;  %v611_v52 = vpop.permute.xlu0 %610 }
 0x170   :  { %v627_v38 = vadd.f32 %v611_v52, %v1289_v2 }
 0x175   :  { %v593_v20 = vpop.permute.xlu2 %592 }
 0x176   :  { %v624_v21 = vadd.f32 %v593_v20, %v1269_v48  ;;  %v545_v23 = vpop.permute.xlu1 %544 }
 0x177   :  { %v616_v37 = vadd.f32 %v545_v23, %v1204_v43 }
 0x178   :  { %668 = vrot.lane.b32.xlu2 %v624_v21, %s1086_s0 }
 0x17d   :  { %v605_v25 = vpop.permute.xlu2 %604 }
 0x17e   :  { %v626_v26 = vadd.f32 %v605_v25, %v1289_v2 }
 0x180   :  { %650 = vrot.lane.b32.xlu2 %v615_v22, %s1086_s0 }
 0x186   :  { %v563_v28 = vpop.permute.xlu1 %562 }
 0x187   :  { %v619_v17 = vadd.f32 %v563_v28, %v1219_v60  ;;  %v612_v60 = vadd.f32 %v1341_v8, %v1207_v46 }
 0x188   :  { %672 = vrot.lane.b32.xlu2 %v626_v26, %s1086_s0 }
 0x189   :  { %658 = vrot.lane.b32.xlu1 %v619_v17, %s1086_s0 }
 0x18d   :  { %v575_v29 = vpop.permute.xlu2 %574 }
 0x18e   :  { %v621_v0 = vadd.f32 %v575_v29, %v1259_v36  ;;  %v599_v33 = vpop.permute.xlu1 %598 }
 0x18f   :  { %v625_v31 = vadd.f32 %v599_v33, %v1269_v48 }
 0x190   :  { %662 = vrot.lane.b32.xlu2 %v621_v0, %s1086_s0 }
 0x191   :  { %648 = vrot.lane.b32.xlu1 %v614_v35, %s1086_s0  ;;  %670 = vrot.lane.b32.xlu0 %v625_v31, %s1086_s0 }
 0x195   :  { %v587_v43 = vpop.permute.xlu2 %586 }
 0x196   :  { %v623_v8 = vadd.f32 %v587_v43, %v1253_v27 }
 0x198   :  { %644 = vrot.lane.b32.xlu2 %v612_v60, %s1086_s0 }
 0x199   :  { %654 = vrot.lane.b32.xlu1 %v617_v39, %s1086_s0  ;;  %652 = vrot.lane.b32.xlu0 %v616_v37, %s1086_s0 }
 0x19e   :  { %v569_v48 = vpop.permute.xlu1 %568 }
 0x19f   :  { %v620_v53 = vadd.f32 %v569_v48, %v1259_v36 }
 0x1a0   :  { %438 = vrot.lane.b32.xlu2 %v1332_v61, %s1087_s1 }
 0x1a1   :  { %674 = vrot.lane.b32.xlu0 %v627_v38, %s1086_s0  ;;  %660 = vrot.lane.b32.xlu1 %v620_v53, %s1086_s0 }
 0x1a6   :  { %v581_v46 = vpop.permute.xlu1 %580 }
 0x1a7   :  { %v622_v30 = vadd.f32 %v581_v46, %v1253_v27 }
 0x1a8   :  { %446 = vrot.lane.b32.xlu2 %v1344_v9, %s1088_s24 }
 0x1a9   :  { %666 = vrot.lane.b32.xlu1 %v623_v8, %s1086_s0  ;;  %664 = vrot.lane.b32.xlu0 %v622_v30, %s1086_s0 }
 0x1b0   :  { %458 = vrot.lane.b32.xlu2 %v1347_v11, %s1089_s25 }
 0x1b1   :  { %442 = vrot.lane.b32.xlu1 %v1353_v18, %s1090_s26  ;;  %646 = vrot.lane.b32.xlu0 %v1296_v5, %s1086_s0 }
 0x1b8   :  { %470 = vrot.lane.b32.xlu2 %v426_v58, %s1090_s26 }
 0x1b9   :  { %454 = vrot.lane.b32.xlu1 %v1327_v54, %s1091_s27  ;;  %450 = vrot.lane.b32.xlu0 %v1336_v6, %s1092_s28 }
 0x1c0   :  { %482 = vrot.lane.b32.xlu2 %v432_v56, %s1091_s27 }
 0x1c1   :  { %466 = vrot.lane.b32.xlu1 %v424_v63, %s1087_s1  ;;  %462 = vrot.lane.b32.xlu0 %v1339_v7, %s1086_s0 }
 0x1c9   :  { %478 = vrot.lane.b32.xlu1 %v430_v3, %s1092_s28  ;;  %474 = vrot.lane.b32.xlu0 %v1386_v10, %s1088_s24 }
 0x1ca   :  { %v1455_v2 = vpop.permute.xlu0 %656 }
 0x1cb   :  { %v704_v41 = vrot.slane %v1455_v2, 4 }
 0x1d1   :  { %490 = vrot.lane.b32.xlu1 %v1380_v44, %s1086_s0  ;;  %486 = vrot.lane.b32.xlu0 %v1389_v51, %s1089_s25 }
 0x1d2   :  { %v1453_v27 = vpop.permute.xlu2 %668 }
 0x1d3   :  { %v716_v44 = vrot.slane %v1453_v27, 4 }
 0x1da   :  { %v651_v36 = vpop.permute.xlu2 %650 }
 0x1db   :  { %v818_v12 = vrot.slane %v651_v36, 4 }
 0x1e2   :  { %v673_v54 = vpop.permute.xlu2 %672 }
 0x1e3   :  { %v728_v10 = vrot.slane %v673_v54, 4 }
 0x1ea   :  { %v1461_v7 = vpop.permute.xlu2 %662 }
 0x1eb   :  { %v830_v3 = vrot.slane %v1461_v7, 4 }
 0x1f2   :  { %v645_v40 = vpop.permute.xlu2 %644 }
 0x1f3   :  { %v694_v4 = vrot.slane %v645_v40, 4 }
 0x1fa   :  { %v439_v56 = vpop.permute.xlu2 %438 }
 0x1fb   :  { %v659_v5 = vpop.permute.xlu1 %658  ;;  %v494_v17 = vsel %vm493_vm1, %v1350_v15, %v439_v56 }
 0x1fc   :  { %v816_v62 = vrot.slane %v659_v5, 4  ;;  %v819_v19 = vsel %vm213_vm0, %v659_v5, %v818_v12 }
 0x1fd   :  { %v1498_v35 = vperm.slane %v819_v19, %v1214_v55 }
 0x1fe   :  { %v817_v49 = vsel %vm213_vm0, %v816_v62, %v651_v36 }
 0x1ff   :  { %v1484_v57 = vperm.slane %v817_v49, %v1214_v55 }
 0x201   :  { %v852_v31 = vrot.slane %v1484_v57, 4 }
 0x203   :  { %v1457_v61 = vpop.permute.xlu0 %670  ;;  %v1459_v6 = vpop.permute.xlu1 %648 }
 0x204   :  { %v705_v16 = vsel %vm213_vm0, %v704_v41, %v1459_v6  ;;  %v828_v1 = vrot.slane %v1457_v61, 4  ;;  %v706_v37 = vrot.slane %v1459_v6, 4 }
 0x205   :  { %v711_v13 = vperm.slane %v705_v16, %v1214_v55 }
 0x206   :  { %v829_v50 = vsel %vm213_vm0, %v828_v1, %v1461_v7  ;;  %v707_v41 = vsel %vm213_vm0, %v1455_v2, %v706_v37 }
 0x207   :  { %v740_v58 = vrot.slane %v711_v13, 4  ;;  %v835_v20 = vperm.slane %v829_v50, %v1214_v55  ;;  %v1541_v50 = vperm.slane %v707_v41, %v1214_v55 }
 0x209   :  { %v878_v38 = vrot.slane %v835_v20, 4 }
 0x20b   :  { %v1463_v9 = vpop.permute.xlu0 %652  ;;  %v1465_v11 = vpop.permute.xlu1 %654 }
 0x20c   :  { %v692_v18 = vrot.slane %v1463_v9, 4  ;;  %v804_v8 = vrot.slane %v1465_v11, 4  ;;  %v695_v62 = vsel %vm213_vm0, %v1463_v9, %v694_v4 }
 0x20d   :  { %v1547_v56 = vperm.slane %v695_v62, %v1214_v55 }
 0x20e   :  { %v693_v42 = vsel %vm213_vm0, %v692_v18, %v645_v40  ;;  %v831_v40 = vsel %vm213_vm0, %v1457_v61, %v830_v3 }
 0x20f   :  { %v699_v45 = vperm.slane %v693_v42, %v1214_v55 }
 0x211   :  { %v742_v59 = vrot.slane %v699_v45, 4  ;;  %v741_v28 = vsel %vm213_vm0, %v740_v58, %v699_v45 }
 0x212   :  { %v1506_v15 = vperm.slane %v741_v28, %v1304_v24 }
 0x213   :  { %v1472_v32 = vpop.permute.xlu0 %674  ;;  %v661_v34 = vpop.permute.xlu1 %660  ;;  %v743_v39 = vsel %vm213_vm0, %v711_v13, %v742_v59 }
 0x214   :  { %v717_v47 = vsel %vm213_vm0, %v716_v44, %v661_v34  ;;  %v840_v63 = vrot.slane %v1472_v32, 4  ;;  %v718_v53 = vrot.slane %v661_v34, 4  ;;  %v1516_v36 = vperm.slane %v743_v39, %v1304_v24  ;;  %v447_v44 = vpop.permute.xlu2 %446 }
 0x215   :  { %v723_v51 = vperm.slane %v717_v47, %v1214_v55  ;;  %v790_v34 = vrot.slane %v1506_v15, 4 }
 0x216   :  { %v719_v1 = vsel %vm213_vm0, %v1453_v27, %v718_v53 }
 0x217   :  { %v766_v29 = vrot.slane %v723_v51, 4  ;;  %v1550_v58 = vperm.slane %v719_v1, %v1214_v55 }
 0x21b   :  { %v665_v21 = vpop.permute.xlu0 %664  ;;  %v667_v22 = vpop.permute.xlu1 %666 }
 0x21c   :  { %v729_v23 = vsel %vm213_vm0, %v728_v10, %v665_v21  ;;  %v730_v25 = vrot.slane %v665_v21, 4  ;;  %v841_v26 = vsel %vm213_vm0, %v840_v63, %v667_v22  ;;  %v842_v13 = vrot.slane %v667_v22, 4 }
 0x21d   :  { %v735_v0 = vperm.slane %v729_v23, %v1214_v55  ;;  %v847_v33 = vperm.slane %v841_v26, %v1214_v55  ;;  %v752_v26 = vrot.slane %v1541_v50, 4 }
 0x21e   :  { %v731_v60 = vsel %vm213_vm0, %v673_v54, %v730_v25  ;;  %v843_v59 = vsel %vm213_vm0, %v1472_v32, %v842_v13 }
 0x21f   :  { %v764_v52 = vrot.slane %v735_v0, 4  ;;  %v767_v48 = vsel %vm213_vm0, %v735_v0, %v766_v29  ;;  %v876_v43 = vrot.slane %v847_v33, 4  ;;  %v1513_v30 = vperm.slane %v731_v60, %v1214_v55 }
 0x220   :  { %v1509_v46 = vperm.slane %v767_v48, %v1304_v24  ;;  %v879_v54 = vsel %vm213_vm0, %v847_v33, %v878_v38  ;;  %v851_v32 = vperm.slane %v843_v59, %v1214_v55 }
 0x221   :  { %v765_v5 = vsel %vm213_vm0, %v764_v52, %v723_v51  ;;  %v877_v18 = vsel %vm213_vm0, %v876_v43, %v835_v20  ;;  %v887_v9 = vperm.slane %v879_v54, %v1304_v24  ;;  %v776_v27 = vrot.slane %v1513_v30, 4  ;;  %v459_v52 = vpop.permute.xlu2 %458 }
 0x222   :  { %v792_v6 = vrot.slane %v1509_v46, 4  ;;  %v771_v7 = vperm.slane %v765_v5, %v1304_v24  ;;  %v883_v49 = vperm.slane %v877_v18, %v1304_v24  ;;  %v839_v43 = vperm.slane %v831_v40, %v1214_v55 }
 0x223   :  { %v647_v16 = vpop.permute.xlu0 %646  ;;  %v443_v42 = vpop.permute.xlu1 %442  ;;  %v904_v19 = vrot.slane %v887_v9, 4  ;;  %v777_v25 = vsel %vm213_vm0, %v776_v27, %v1550_v58  ;;  %v864_v5 = vrot.slane %v1498_v35, 4  ;;  %v794_v18 = vrot.slane %v1516_v36, 4 }
 0x224   :  { %v805_v45 = vsel %vm213_vm0, %v804_v8, %v647_v16  ;;  %v793_v61 = vsel %vm213_vm0, %v792_v6, %v1516_v36  ;;  %v791_v2 = vsel %vm213_vm0, %v771_v7, %v790_v34  ;;  %v806_v12 = vrot.slane %v647_v16, 4 }
 0x225   :  { %v811_v47 = vperm.slane %v805_v45, %v1214_v55  ;;  %921 = vrot.lane.b32.xlu0 %v793_v61, %s1090_s26  ;;  %917 = vrot.lane.b32.xlu1 %v791_v2, %s1087_s1  ;;  %v496_v3 = vsel %vm495_vm2, %v494_v17, %v443_v42  ;;  %v900_v20 = vrot.slane %v883_v49, 4  ;;  %v788_v21 = vrot.slane %v771_v7, 4 }
 0x226   :  { %v807_v28 = vsel %vm213_vm0, %v1465_v11, %v806_v12  ;;  %v498_v0 = vsel %vm497_vm3, %v496_v3, %v447_v44  ;;  %v753_v11 = vsel %vm213_vm0, %v752_v26, %v1547_v56  ;;  %v783_v37 = vperm.slane %v777_v25, %v1304_v24 }
 0x227   :  { %v853_v10 = vsel %vm213_vm0, %v852_v31, %v811_v47  ;;  %v854_v51 = vrot.slane %v811_v47, 4  ;;  %v815_v48 = vperm.slane %v807_v28, %v1214_v55  ;;  %v1581_v53 = vsel %vm213_vm0, %v788_v21, %v1506_v15 }
 0x228   :  { %v859_v63 = vperm.slane %v853_v10, %v1304_v24  ;;  %v888_v8 = vrot.slane %v851_v32, 4  ;;  %v759_v6 = vperm.slane %v753_v11, %v1304_v24  ;;  %v796_v7 = vrot.slane %v783_v37, 4 }
 0x229   :  { %v855_v4 = vsel %vm213_vm0, %v1484_v57, %v854_v51  ;;  %v865_v41 = vsel %vm213_vm0, %v864_v5, %v815_v48  ;;  %v890_v15 = vrot.slane %v839_v43, 4  ;;  %v866_v62 = vrot.slane %v815_v48, 4 }
 0x22a   :  { %v863_v22 = vperm.slane %v855_v4, %v1304_v24  ;;  %v902_v23 = vrot.slane %v859_v63, 4  ;;  %v1566_v57 = vsel %vm213_vm0, %v900_v20, %v859_v63  ;;  %v889_v42 = vsel %vm213_vm0, %v888_v8, %v839_v43 }
 0x22b   :  { %v451_v17 = vpop.permute.xlu0 %450  ;;  %v455_v29 = vpop.permute.xlu1 %454  ;;  %v795_v44 = vsel %vm213_vm0, %v1509_v46, %v794_v18  ;;  %v798_v1 = vrot.slane %v759_v6, 4  ;;  %v797_v13 = vsel %vm213_vm0, %v796_v7, %v759_v6  ;;  %v871_v36 = vperm.slane %v865_v41, %v1304_v24 }
 0x22c   :  { %v905_v33 = vsel %vm213_vm0, %v904_v19, %v863_v22  ;;  %v903_v31 = vsel %vm213_vm0, %v883_v49, %v902_v23  ;;  %v906_v60 = vrot.slane %v863_v22, 4  ;;  %v500_v39 = vsel %vm499_vm4, %v498_v0, %v451_v17  ;;  %v471_v49 = vpop.permute.xlu2 %470 }
 0x22d   :  { %945 = vrot.lane.b32.xlu2 %v903_v31, %s1087_s1  ;;  %949 = vrot.lane.b32.xlu1 %v905_v33, %s1090_s26  ;;  %v502_v54 = vsel %vm501_vm5, %v500_v39, %v455_v29  ;;  %v891_v45 = vsel %vm213_vm0, %v851_v32, %v890_v15  ;;  %v799_v61 = vsel %vm213_vm0, %v783_v37, %v798_v1  ;;  %v754_v2 = vrot.slane %v1547_v56, 4 }
 0x22e   :  { %v907_v38 = vsel %vm213_vm0, %v887_v9, %v906_v60  ;;  %v504_v55 = vsel %vm503_vm6, %v502_v54, %v459_v52  ;;  %v895_v47 = vperm.slane %v889_v42, %v1304_v24  ;;  %v778_v46 = vrot.slane %v1550_v58, 4 }
 0x22f   :  { %953 = vrot.lane.b32.xlu0 %v907_v38, %s1088_s24  ;;  %v867_v9 = vsel %vm213_vm0, %v1498_v35, %v866_v62  ;;  %v899_v27 = vperm.slane %v891_v45, %v1304_v24  ;;  %v910_v10 = vrot.slane %v871_v36, 4  ;;  %v755_v3 = vsel %vm213_vm0, %v1541_v50, %v754_v2 }
 0x230   :  { %v779_v51 = vsel %vm213_vm0, %v1513_v30, %v778_v46  ;;  %v908_v59 = vrot.slane %v895_v47, 4  ;;  %v875_v56 = vperm.slane %v867_v9, %v1304_v24  ;;  %v763_v50 = vperm.slane %v755_v3, %v1304_v24 }
 0x231   :  { %v912_v19 = vrot.slane %v899_v27, 4  ;;  %v787_v20 = vperm.slane %v779_v51, %v1304_v24  ;;  %v911_v21 = vsel %vm213_vm0, %v895_v47, %v910_v10 }
 0x232   :  { %v909_v4 = vsel %vm213_vm0, %v908_v59, %v871_v36  ;;  %v802_v17 = vrot.slane %v763_v50, 4  ;;  %v914_v24 = vrot.slane %v875_v56, 4 }
 0x233   :  { %v463_v16 = vpop.permute.xlu0 %462  ;;  %v467_v40 = vpop.permute.xlu1 %466  ;;  %v913_v30 = vsel %vm213_vm0, %v912_v19, %v875_v56  ;;  %v800_v23 = vrot.slane %v787_v20, 4 }
 0x234   :  { %v506_v34 = vsel %vm505_vm7, %v504_v55, %v463_v16  ;;  %v507_v12 = vsel %vm493_vm1, %v1396_v14, %v467_v40  ;;  %v483_v25 = vpop.permute.xlu2 %482  ;;  %v803_v31 = vsel %vm213_vm0, %v787_v20, %v802_v17  ;;  %v915_v60 = vsel %vm213_vm0, %v899_v27, %v914_v24 }
 0x235   :  { %514 = vst [vmem:[#allocation2] sm:$0xff] %v506_v34  ;;  %925 = vrot.lane.b32.xlu2 %v795_v44, %s1088_s24  ;;  %929 = vrot.lane.b32.xlu1 %v797_v13, %s1092_s28  ;;  %v508_v35 = vsel %vm495_vm2, %v507_v12, %v471_v49  ;;  %v801_v0 = vsel %vm213_vm0, %v800_v23, %v763_v50 }
 0x237   :  { %933 = vrot.lane.b32.xlu0 %v799_v61, %s1091_s27 }
 0x23b   :  { %v475_v63 = vpop.permute.xlu0 %474  ;;  %v479_v58 = vpop.permute.xlu1 %478 }
 0x23c   :  { %v509_v14 = vsel %vm497_vm3, %v508_v35, %v475_v63 }
 0x23d   :  { %957 = vrot.lane.b32.xlu2 %v909_v4, %s1092_s28  ;;  %961 = vrot.lane.b32.xlu1 %v911_v21, %s1091_s27  ;;  %v510_v22 = vsel %vm499_vm4, %v509_v14, %v479_v58 }
 0x23e   :  { %v511_v32 = vsel %vm501_vm5, %v510_v22, %v483_v25 }
 0x23f   :  { %965 = vrot.lane.b32.xlu0 %v913_v30, %s1089_s25 }
 0x243   :  { %v487_v26 = vpop.permute.xlu0 %486  ;;  %v491_v28 = vpop.permute.xlu1 %490 }
 0x244   :  { %v512_v29 = vsel %vm503_vm6, %v511_v32, %v487_v26 }
 0x245   :  { %v513_v33 = vsel %vm505_vm7, %v512_v29, %v491_v28  ;;  %937 = vrot.lane.b32.xlu2 %v801_v0, %s1089_s25  ;;  %941 = vrot.lane.b32.xlu1 %v803_v31, %s1086_s0 }
 0x246   :  { %515 = vst [vmem:[#allocation2 + $0x8] sm:$0xff] %v513_v33 }
 0x24d   :  { %969 = vrot.lane.b32.xlu2 %v915_v60, %s1086_s0 }
 0x287   :  { %v946_v39 = vpop.permute.xlu2 %945 }
 0x288   :  { %v979_v54 = vsel %vm493_vm1, %v1566_v57, %v946_v39 }
 0x28f   :  { %v926_v11 = vpop.permute.xlu2 %925 }
 0x297   :  { %v918_v37 = vpop.permute.xlu1 %917  ;;  %v922_v52 = vpop.permute.xlu0 %921 }
 0x298   :  { %v958_v48 = vpop.permute.xlu2 %957  ;;  %v972_v18 = vsel %vm493_vm1, %v1581_v53, %v918_v37 }
 0x299   :  { %v973_v15 = vsel %vm495_vm2, %v972_v18, %v922_v52 }
 0x29a   :  { %v974_v55 = vsel %vm497_vm3, %v973_v15, %v926_v11 }
 0x29f   :  { %v950_v38 = vpop.permute.xlu1 %949 }
 0x2a0   :  { %v938_v8 = vpop.permute.xlu2 %937  ;;  %v980_v7 = vsel %vm495_vm2, %v979_v54, %v950_v38 }
 0x2a1   :  { %v954_v43 = vpop.permute.xlu0 %953 }
 0x2a2   :  { %v981_v41 = vsel %vm497_vm3, %v980_v7, %v954_v43 }
 0x2a3   :  { %v982_v62 = vsel %vm499_vm4, %v981_v41, %v958_v48 }
 0x2a7   :  { %v930_v5 = vpop.permute.xlu1 %929 }
 0x2a8   :  { %v970_v34 = vpop.permute.xlu2 %969  ;;  %v975_v57 = vsel %vm499_vm4, %v974_v55, %v930_v5 }
 0x2a9   :  { %v934_v6 = vpop.permute.xlu0 %933 }
 0x2aa   :  { %v976_v53 = vsel %vm501_vm5, %v975_v57, %v934_v6 }
 0x2ab   :  { %v977_v13 = vsel %vm503_vm6, %v976_v53, %v938_v8 }
 0x2af   :  { %v962_v16 = vpop.permute.xlu1 %961 }
 0x2b0   :  { %v983_v40 = vsel %vm501_vm5, %v982_v62, %v962_v16 }
 0x2b1   :  { %v966_v42 = vpop.permute.xlu0 %965 }
 0x2b2   :  { %v984_v44 = vsel %vm503_vm6, %v983_v40, %v966_v42 }
 0x2b3   :  { %v985_v1 = vsel %vm505_vm7, %v984_v44, %v970_v34 }
 0x2b4   :  { %988 = vst [vmem:[#allocation2 + $0x18] sm:$0xff] %v985_v1 }
 0x2b7   :  { %v942_v36 = vpop.permute.xlu1 %941 }
 0x2b8   :  { %v978_v45 = vsel %vm505_vm7, %v977_v13, %v942_v36 }
 0x2b9   :  { %987 = vst [vmem:[#allocation2 + $0x10] sm:$0xff] %v978_v45 }
 0x2ba   :  { %1001 = dma.vmem_to_hbm [thread:$0]  %s994_s6, 512, %s996_s4, [#allocation3], %s1094_s7, %s1094_s7, %s1087_s1  }
 0x2bb   :  { %1081 = dma.done.wait [#allocation3], 512  }
 0x2bc   :  { %1082 = vsyncadd [#allocation3], 4294966784 }
 0x2bd   :  { %1006 = vsyncpa [#allocation3], 1 }

</bundles_post_ra>
